<compile_context>
chip_gen: v7x
topology: tpu7x:2x2x1
jax: 0.10.0
libtpu: 0.0.40
codegen_flags: <defaults>
</compile_context>

<pallas_src>
import functools
import math

import jax
import jax.numpy as jnp
from jax.experimental import pallas as pl
from jax.experimental.pallas import tpu as pltpu


# ----------------------------------------------------------------------------
# shared math helpers (used inside kernels and in the pure-JAX reference)
# ----------------------------------------------------------------------------
_INV_SQRT2 = 1.0 / math.sqrt(2.0)
_NEG_BIG = -1e9  # finite "masked" bias (avoids -inf - -inf = NaN for fully masked rows)


def _gelu_exact(x):
    # matches torch.nn.GELU() / F.gelu (erf formulation)
    return 0.5 * x * (1.0 + jax.lax.erf(x * _INV_SQRT2))


def _ln(x, g, b, eps=1e-5):
    mu = jnp.mean(x, axis=-1, keepdims=True)
    var = jnp.mean((x - mu) ** 2, axis=-1, keepdims=True)
    return (x - mu) * jax.lax.rsqrt(var + eps) * g + b


def _cparams(n_grid):
    return pltpu.CompilerParams(
        dimension_semantics=("parallel",) * n_grid,
        vmem_limit_bytes=64 * 1024 * 1024,
    )


def _pick_seq_tile(S, target=512):
    if S <= target:
        return S
    for ts in range(target, 0, -8):
        if S % ts == 0:
            return ts
    return S


# ----------------------------------------------------------------------------
# Pallas kernel: positional grouped conv + SamePad + GELU + residual
#   grid = (batch, group); one im2col contraction per grid cell.
# ----------------------------------------------------------------------------
def _pos_conv_kernel(x_ref, w_ref, b_ref, o_ref, col_ref, *, K, T, cg, pad):
    x = x_ref[0, 0]                                  # (T, cg) f32, this group's channels
    # build im2col: col[t, kk*cg + ci] = x[t + kk - pad, ci] (zeros outside [0, T))
    col_ref[...] = jnp.zeros(col_ref.shape, jnp.float32)
    for kk in range(K):
        lo = max(0, pad - kk)
        hi = min(T, T + pad - kk)
        if hi > lo:
            col_ref[lo:hi, kk * cg:(kk + 1) * cg] = x[lo + kk - pad:hi + kk - pad, :]
    acc = jnp.dot(col_ref[...].astype(jnp.bfloat16), w_ref[0],
                  preferred_element_type=jnp.float32) + b_ref[0, 0]
    o_ref[0, 0] = x + _gelu_exact(acc)


def pos_conv_add(xg, wg_bf16_src, bg, K):
    # xg: (B, groups, T, cg) masked input; wg: (groups, K*cg, cg); bg: (groups, 1, cg)
    B, groups, T, cg = xg.shape
    # TODO(synk): for very long T, tile the sequence axis of this kernel as well.
    kernel = functools.partial(_pos_conv_kernel, K=K, T=T, cg=cg, pad=K // 2)
    return pl.pallas_call(
        kernel,
        out_shape=jax.ShapeDtypeStruct((B, groups, T, cg), jnp.float32),
        grid=(B, groups),
        in_specs=[
            pl.BlockSpec((1, 1, T, cg), lambda b, g: (b, g, 0, 0)),
            pl.BlockSpec((1, K * cg, cg), lambda b, g: (g, 0, 0)),
            pl.BlockSpec((1, 1, cg), lambda b, g: (g, 0, 0)),
        ],
        out_specs=pl.BlockSpec((1, 1, T, cg), lambda b, g: (b, g, 0, 0)),
        scratch_shapes=[pltpu.VMEM((T, K * cg), jnp.float32)],
        compiler_params=_cparams(2),
    )(xg, wg_bf16_src.astype(jnp.bfloat16), bg)


# ----------------------------------------------------------------------------
# Pallas kernel: prepend global tokens + encoder LayerNorm + zero pad rows
# ----------------------------------------------------------------------------
def _prep_kernel(conv_ref, gt_ref, g_ref, b_ref, o_ref, *, G, T):
    g = g_ref[0]
    b = b_ref[0]
    o_ref[0, :G, :] = _ln(gt_ref[...], g, b)
    o_ref[0, G:G + T, :] = _ln(conv_ref[0], g, b)
    S_pad = o_ref.shape[1]
    if S_pad > G + T:
        o_ref[0, G + T:, :] = jnp.zeros((S_pad - G - T, o_ref.shape[2]), jnp.float32)


def prep_encode(conv, global_tokens, ln_g, ln_b, G, S_pad):
    B, T, E = conv.shape
    kernel = functools.partial(_prep_kernel, G=G, T=T)
    return pl.pallas_call(
        kernel,
        out_shape=jax.ShapeDtypeStruct((B, S_pad, E), jnp.float32),
        grid=(B,),
        in_specs=[
            pl.BlockSpec((1, T, E), lambda b: (b, 0, 0)),
            pl.BlockSpec((G, E), lambda b: (0, 0)),
            pl.BlockSpec((1, E), lambda b: (0, 0)),
            pl.BlockSpec((1, E), lambda b: (0, 0)),
        ],
        out_specs=pl.BlockSpec((1, S_pad, E), lambda b: (b, 0, 0)),
        compiler_params=_cparams(1),
    )(conv, global_tokens, ln_g.reshape(1, E), ln_b.reshape(1, E))


# ----------------------------------------------------------------------------
# Pallas kernel: fused per-layer cross attention (attn1 -> attn2) + residual + LN1
# ----------------------------------------------------------------------------
def _mha_heads(q_bf, kv_bf, bias, wq, bq, wk, bk, wv, bv, wo, bo, H, hd):
    # q_bf (Lq, E) bf16, kv_bf (Lk, E) bf16, bias None or (1, Lk) f32 additive.
    # wq/wk/wv refs: (H, E, hd) bf16; bq/bk/bv: (H, 1, hd) f32;
    # wo ref: (H, hd, E) bf16; bo: (1, E) f32.
    Lq = q_bf.shape[0]
    E = H * hd
    scale = hd ** -0.5
    out = jnp.zeros((Lq, E), jnp.float32)
    for h in range(H):
        q_h = (jnp.dot(q_bf, wq[h], preferred_element_type=jnp.float32) + bq[h]) * scale
        k_h = jnp.dot(kv_bf, wk[h], preferred_element_type=jnp.float32) + bk[h]
        v_h = jnp.dot(kv_bf, wv[h], preferred_element_type=jnp.float32) + bv[h]
        s = jax.lax.dot_general(q_h.astype(jnp.bfloat16), k_h.astype(jnp.bfloat16),
                                (((1,), (1,)), ((), ())),
                                preferred_element_type=jnp.float32)      # (Lq, Lk)
        if bias is not None:
            s = s + bias
        m = jnp.max(s, axis=-1, keepdims=True)
        p = jnp.exp(s - m)
        l = jnp.sum(p, axis=-1, keepdims=True)
        ctx = jnp.dot(p.astype(jnp.bfloat16), v_h.astype(jnp.bfloat16),
                      preferred_element_type=jnp.float32)                # (Lq, hd)
        ctx = ctx * pl.reciprocal(l, approx=True)
        # fold per-head context straight into the output projection accumulator
        out = out + jnp.dot(ctx.astype(jnp.bfloat16), wo[h],
                            preferred_element_type=jnp.float32)
    return out + bo[0]


def _attn_layer_kernel(x_ref, bias_ref,
                       wq1, bq1, wk1, bk1, wv1, bv1, wo1, bo1,
                       wq2, bq2, wk2, bk2, wv2, bv2, wo2, bo2,
                       ln1g, ln1b, o_ref, *, G, H, hd):
    x = x_ref[0]                               # (S, E) f32 (residual)
    g_tok = x[:G]
    x_orig = x[G:]
    g_bf = g_tok.astype(jnp.bfloat16)
    xo_bf = x_orig.astype(jnp.bfloat16)

    # global tokens attend to the sequence (key padding bias on sequence keys)
    g_new = _mha_heads(g_bf, xo_bf, bias_ref[0],
                       wq1, bq1, wk1, bk1, wv1, bv1, wo1, bo1, H, hd)
    # sequence attends to the updated global tokens (never padded -> no bias)
    x_new = _mha_heads(xo_bf, g_new.astype(jnp.bfloat16), None,
                       wq2, bq2, wk2, bk2, wv2, bv2, wo2, bo2, H, hd)

    gg, bb = ln1g[0], ln1b[0]
    # write both halves of LN1(residual + attn_out) directly (no concat)
    o_ref[0, :G, :] = _ln(g_tok + g_new, gg, bb)
    o_ref[0, G:, :] = _ln(x_orig + x_new, gg, bb)


def _split_heads_w(w, H, hd):
    E = w.shape[0]
    return jnp.transpose(w.reshape(E, H, hd), (1, 0, 2)).astype(jnp.bfloat16)   # (H, E, hd)


def _split_heads_b(b, H, hd):
    return b.reshape(H, 1, hd).astype(jnp.float32)


def attn_layer(x, x_bias, G, lp):
    B, S, E = x.shape
    L = S - G
    H = lp["attn1"]["num_heads"]
    hd = E // H

    w_qkv_spec = pl.BlockSpec((H, E, hd), lambda b: (0, 0, 0))
    b_qkv_spec = pl.BlockSpec((H, 1, hd), lambda b: (0, 0, 0))
    w_o_spec = pl.BlockSpec((H, hd, E), lambda b: (0, 0, 0))
    vecE = pl.BlockSpec((1, E), lambda b: (0, 0))
    act = pl.BlockSpec((1, S, E), lambda b: (b, 0, 0))

    def attn_ops(ap):
        return [
            _split_heads_w(ap["wq"], H, hd), _split_heads_b(ap["bq"], H, hd),
            _split_heads_w(ap["wk"], H, hd), _split_heads_b(ap["bk"], H, hd),
            _split_heads_w(ap["wv"], H, hd), _split_heads_b(ap["bv"], H, hd),
            ap["wo"].reshape(H, hd, E).astype(jnp.bfloat16),
            ap["bo"].reshape(1, E).astype(jnp.float32),
        ]

    attn_specs = [w_qkv_spec, b_qkv_spec, w_qkv_spec, b_qkv_spec,
                  w_qkv_spec, b_qkv_spec, w_o_spec, vecE]

    ops = ([x, x_bias] + attn_ops(lp["attn1"]) + attn_ops(lp["attn2"]) +
           [lp["ln1_g"].reshape(1, E), lp["ln1_b"].reshape(1, E)])
    specs = ([act, pl.BlockSpec((1, 1, L), lambda b: (b, 0, 0))] +
             attn_specs + attn_specs + [vecE, vecE])

    kernel = functools.partial(_attn_layer_kernel, G=G, H=H, hd=hd)
    return pl.pallas_call(
        kernel,
        out_shape=jax.ShapeDtypeStruct((B, S, E), jnp.float32),
        grid=(B,),
        in_specs=specs,
        out_specs=act,
        compiler_params=_cparams(1),
    )(*ops)


# ----------------------------------------------------------------------------
# Pallas kernel: FFN + residual + LN2 (tiled over the sequence axis)
# ----------------------------------------------------------------------------
def _ffn_kernel(x_ref, w1_ref, b1_ref, w2_ref, b2_ref, g_ref, b_ref, o_ref, lr_ref):
    x = x_ref[0]                                          # (ts, E) f32
    h = _gelu_exact(jnp.dot(x.astype(jnp.bfloat16), w1_ref[...],
                            preferred_element_type=jnp.float32) + b1_ref[0])
    h = jnp.dot(h.astype(jnp.bfloat16), w2_ref[...],
                preferred_element_type=jnp.float32) + b2_ref[0]
    lr_ref[0] = h                                         # layer_result (pre-residual)
    o_ref[0] = _ln(x + h, g_ref[0], b_ref[0])


def ffn_block(x1, lp):
    B, S, E = x1.shape
    F = lp["w1"].shape[1]
    ts = _pick_seq_tile(S)
    ns = S // ts
    # TODO(synk): for E/F at real HuBERT scale also tile F as a reduction axis.
    act = pl.BlockSpec((1, ts, E), lambda b, s: (b, s, 0))
    vecE = pl.BlockSpec((1, E), lambda b, s: (0, 0))
    vecF = pl.BlockSpec((1, F), lambda b, s: (0, 0))
    return pl.pallas_call(
        _ffn_kernel,
        out_shape=(jax.ShapeDtypeStruct((B, S, E), jnp.float32),
                   jax.ShapeDtypeStruct((B, S, E), jnp.float32)),
        grid=(B, ns),
        in_specs=[
            act,
            pl.BlockSpec((E, F), lambda b, s: (0, 0)), vecF,
            pl.BlockSpec((F, E), lambda b, s: (0, 0)), vecE,
            vecE, vecE,
        ],
        out_specs=(act, act),
        compiler_params=_cparams(2),
    )(x1, lp["w1"].astype(jnp.bfloat16), lp["b1"].reshape(1, F),
      lp["w2"].astype(jnp.bfloat16), lp["b2"].reshape(1, E),
      lp["ln2_g"].reshape(1, E), lp["ln2_b"].reshape(1, E))


# ----------------------------------------------------------------------------
# Encoder forward (glue in JAX, hot paths in Pallas)
# ----------------------------------------------------------------------------
def cross_transformer_encoder_forward(params, x, padding_mask):
    B, T, E = x.shape
    G = params["num_global_tokens"]
    K = params["conv_pos"]
    groups = params["conv_groups"]
    mult = params["required_seq_len_multiple"]
    cg = E // groups

    # index_put(x, padding_mask, 0)
    x = jnp.where(padding_mask[..., None], 0.0, x).astype(jnp.float32)

    # x = x + GELU(SamePad(grouped pos_conv(x)))  -- Pallas, grid (batch, group)
    xg = jnp.transpose(x.reshape(B, T, groups, cg), (0, 2, 1, 3))       # (B, groups, T, cg)
    conv = pos_conv_add(xg, params["pos_conv_wg"], params["pos_conv_bg"], K)
    conv = jnp.transpose(conv, (0, 2, 1, 3)).reshape(B, T, E)

    # prepend global tokens + encoder LayerNorm + pad_to_multiple (fused Pallas kernel)
    S = G + T
    pad_len = (-S) % mult
    S_pad = S + pad_len
    xcur = prep_encode(conv, params["global_tokens"], params["ln_g"], params["ln_b"],
                       G, S_pad)

    pm = jnp.concatenate(
        [jnp.zeros((B, G), bool), padding_mask, jnp.ones((B, pad_len), bool)], axis=1)
    # additive key-padding bias for the sequence keys of attn1
    x_bias = jnp.where(pm[:, G:], _NEG_BIG, 0.0).astype(jnp.float32).reshape(B, 1, S_pad - G)

    # TODO(synk): dropout / layerdrop are training-only stochastic ops; eval no-op here.
    layer_results = []
    for lp in params["layers"]:
        x1 = attn_layer(xcur, x_bias, G, lp)          # cross-attn x2 + residual + LN1
        xcur, lr = ffn_block(x1, lp)                  # FFN + residual + LN2
        layer_results.append((xcur, None, lr))        # (x, attn=None, layer_result)

    if pad_len:
        xcur = xcur[:, :S]
        layer_results = [(a[:, :S], z, c[:, :S]) for a, z, c in layer_results]
    out = xcur[:, G:]
    return out, layer_results


# ----------------------------------------------------------------------------
# Pure-JAX reference (mirrors PyTorch semantics; matmuls use bf16 operands +
# fp32 accumulation to match the kernel precision policy)
# ----------------------------------------------------------------------------
def _bdot(a, w):
    return jnp.einsum("...ij,jk->...ik", a.astype(jnp.bfloat16), w.astype(jnp.bfloat16),
                      preferred_element_type=jnp.float32)


def _ref_mha(q_in, kv_in, bias, p, H):
    B, Lq, E = q_in.shape
    Lk = kv_in.shape[1]
    hd = E // H
    q = (_bdot(q_in, p["wq"]) + p["bq"]) * (hd ** -0.5)
    k = _bdot(kv_in, p["wk"]) + p["bk"]
    v = _bdot(kv_in, p["wv"]) + p["bv"]
    qh = q.reshape(B, Lq, H, hd)
    kh = k.reshape(B, Lk, H, hd)
    vh = v.reshape(B, Lk, H, hd)
    s = jnp.einsum("bqhd,bkhd->bhqk", qh.astype(jnp.bfloat16), kh.astype(jnp.bfloat16),
                   preferred_element_type=jnp.float32)
    if bias is not None:
        s = s + bias[:, None, None, :]
    m = jnp.max(s, axis=-1, keepdims=True)
    e = jnp.exp(s - m)
    l = jnp.sum(e, axis=-1, keepdims=True)
    ctx = jnp.einsum("bhqk,bkhd->bqhd", e.astype(jnp.bfloat16), vh.astype(jnp.bfloat16),
                     preferred_element_type=jnp.float32)
    ctx = ctx / jnp.transpose(l, (0, 2, 1, 3))
    ctx = ctx.reshape(B, Lq, E)
    return _bdot(ctx, p["wo"]) + p["bo"]


def reference_forward(params, x, padding_mask):
    B, T, E = x.shape
    G = params["num_global_tokens"]
    K = params["conv_pos"]
    groups = params["conv_groups"]
    mult = params["required_seq_len_multiple"]
    H = params["num_heads"]
    pad = K // 2

    x = jnp.where(padding_mask[..., None], 0.0, x).astype(jnp.float32)
    conv = jax.lax.conv_general_dilated(
        jnp.transpose(x, (0, 2, 1)).astype(jnp.bfloat16),
        params["pos_conv_w_torch"].astype(jnp.bfloat16), (1,),
        [(pad, pad)], dimension_numbers=("NCH", "OIH", "NCH"),
        feature_group_count=groups, preferred_element_type=jnp.float32)
    conv = conv + params["pos_conv_b_vec"][None, :, None]
    if K % 2 == 0:
        conv = conv[:, :, :-1]                       # SamePad for even kernel
    x = x + _gelu_exact(jnp.transpose(conv, (0, 2, 1)))

    gt = jnp.broadcast_to(params["global_tokens"][None], (B, G, E))
    x = jnp.concatenate([gt, x], axis=1)
    pm = jnp.concatenate([jnp.zeros((B, G), bool), padding_mask], axis=1)
    x = _ln(x, params["ln_g"], params["ln_b"])
    S = x.shape[1]
    pad_len = (-S) % mult
    if pad_len:
        x = jnp.pad(x, ((0, 0), (0, pad_len), (0, 0)))
        pm = jnp.pad(pm, ((0, 0), (0, pad_len)), constant_values=True)
    x_bias = jnp.where(pm[:, G:], _NEG_BIG, 0.0).astype(jnp.float32)

    for lp in params["layers"]:
        residual = x
        g_tok, x_orig = x[:, :G], x[:, G:]
        g_new = _ref_mha(g_tok, x_orig, x_bias, lp["attn1"], H)
        x_new = _ref_mha(x_orig, g_new, None, lp["attn2"], H)
        x = residual + jnp.concatenate([g_new, x_new], axis=1)
        x = _ln(x, lp["ln1_g"], lp["ln1_b"])
        residual = x
        h = _gelu_exact(_bdot(x, lp["w1"]) + lp["b1"])
        h = _bdot(h, lp["w2"]) + lp["b2"]
        x = _ln(residual + h, lp["ln2_g"], lp["ln2_b"])

    if pad_len:
        x = x[:, :-pad_len]
    return x[:, G:]


# ----------------------------------------------------------------------------
# Deterministic synthetic parameter init
# ----------------------------------------------------------------------------
def init_params(key, *, E, H, F, G, K, groups, layers, mult):
    cnt = [0]

    def nk():
        cnt[0] += 1
        return jax.random.fold_in(key, cnt[0])

    cg = E // groups
    std_conv = math.sqrt(4.0 / (K * E))
    w_conv = (std_conv * jax.random.normal(nk(), (E, cg, K))).astype(jnp.float32)  # torch (out, in/g, K)
    # grouped per-tap weights (groups, K*cg, cg): wg[g, kk*cg + ci, co] = w_conv[g*cg + co, ci, kk]
    wg = jnp.transpose(w_conv.reshape(groups, cg, cg, K), (0, 3, 2, 1)).reshape(groups, K * cg, cg)

    def lin_w(din, dout):
        return (0.02 * jax.random.normal(nk(), (din, dout))).astype(jnp.float32)

    def lin_b(d):
        return (0.02 * jax.random.normal(nk(), (d,))).astype(jnp.float32)

    def ln_pair(d):
        return ((1.0 + 0.1 * jax.random.normal(nk(), (d,))).astype(jnp.float32),
                (0.1 * jax.random.normal(nk(), (d,))).astype(jnp.float32))

    ln_g, ln_b = ln_pair(E)
    params = dict(
        num_global_tokens=G, conv_pos=K, conv_groups=groups,
        required_seq_len_multiple=mult, num_heads=H,
        pos_conv_wg=wg, pos_conv_w_torch=w_conv,
        pos_conv_bg=jnp.zeros((groups, 1, cg), jnp.float32),
        pos_conv_b_vec=jnp.zeros((E,), jnp.float32),
        global_tokens=jax.random.uniform(nk(), (G, E), jnp.float32),
        ln_g=ln_g, ln_b=ln_b,
        layers=[],
    )
    for _ in range(layers):
        def attn():
            return dict(num_heads=H,
                        wq=lin_w(E, E), bq=lin_b(E), wk=lin_w(E, E), bk=lin_b(E),
                        wv=lin_w(E, E), bv=lin_b(E), wo=lin_w(E, E), bo=lin_b(E))
        l1g, l1b = ln_pair(E)
        l2g, l2b = ln_pair(E)
        params["layers"].append(dict(
            attn1=attn(), attn2=attn(),
            ln1_g=l1g, ln1_b=l1b,
            w1=lin_w(E, F), b1=lin_b(F), w2=lin_w(F, E), b2=lin_b(E),
            ln2_g=l2g, ln2_b=l2b))
    return params


# ----------------------------------------------------------------------------
if __name__ == "__main__":
    B, T, E = 2, 16, 32          # batch, frames, embed dim
    H, F = 4, 64                 # attention heads, FFN dim
    G = 8                        # num_global_tokens
    K, GROUPS = 4, 4             # conv_pos kernel size (even -> SamePad trims), conv_pos_groups
    LAYERS, MULT = 2, 16         # encoder layers, required_seq_len_multiple

    key = jax.random.PRNGKey(0)
    params = init_params(key, E=E, H=H, F=F, G=G, K=K, groups=GROUPS,
                         layers=LAYERS, mult=MULT)

    x = jax.random.normal(jax.random.fold_in(key, 12345), (B, T, E), jnp.float32)
    lengths = jnp.array([T, T - 4])
    padding_mask = jnp.arange(T)[None, :] >= lengths[:, None]   # (B, T) bool, True = pad

    out, layer_results = cross_transformer_encoder_forward(params, x, padding_mask)
    out = jax.block_until_ready(out)

    ref = reference_forward(params, x, padding_mask)
    assert out.shape == (B, T, E), out.shape
    assert bool(jnp.all(jnp.isfinite(out)))
    max_err = float(jnp.max(jnp.abs(out - ref)))
    assert jnp.allclose(out, ref, atol=1e-2, rtol=1e-2), f"max abs err {max_err}"
    assert len(layer_results) == LAYERS
    assert layer_results[0][2].shape == (B, G + T, E)

    print("KERNEL_OK")
</pallas_src>

<mosaic_0001>
module attributes {stable_mosaic.version = 11 : i64} {
  func.func @_pos_conv_kernel(%arg0: i32, %arg1: i32, %arg2: memref<1x1x16x8xf32, #tpu.memory_space<vmem>>, %arg3: memref<1x32x8xbf16, #tpu.memory_space<vmem>>, %arg4: memref<1x1x8xf32, #tpu.memory_space<vmem>>, %arg5: memref<1x1x16x8xf32, #tpu.memory_space<vmem>>, %arg6: memref<16x32xf32, #tpu.memory_space<vmem>>) attributes {dimension_semantics = [#tpu.dimension_semantics<parallel>, #tpu.dimension_semantics<parallel>], iteration_bounds = array<i64: 2, 4>, scalar_prefetch = 0 : i64, scratch_operands = 1 : i64, tpu.core_type = #tpu.core_type<tc>, window_params = [{transform_indices = @transform_0, window_bounds = array<i64: 1, 1, 16, 8>}, {transform_indices = @transform_1, window_bounds = array<i64: 1, 32, 8>}, {transform_indices = @transform_2, window_bounds = array<i64: 1, 1, 8>}, {transform_indices = @transform_3, window_bounds = array<i64: 1, 1, 16, 8>}]} {
    %c0 = arith.constant 0 : index
    %c0_0 = arith.constant 0 : index
    %c0_1 = arith.constant 0 : index
    %c0_2 = arith.constant 0 : index
    %0 = vector.load %arg2[%c0, %c0_0, %c0_1, %c0_2] : memref<1x1x16x8xf32, #tpu.memory_space<vmem>>, vector<1x1x16x8xf32>
    %1 = vector.shape_cast %0 : vector<1x1x16x8xf32> to vector<16x8xf32>
    %cst = arith.constant 0.000000e+00 : f32
    %2 = vector.broadcast %cst : f32 to vector<16x32xf32>
    %c0_3 = arith.constant 0 : index
    %c0_4 = arith.constant 0 : index
    %3 = vector.load %arg6[%c0_3, %c0_4] : memref<16x32xf32, #tpu.memory_space<vmem>>, vector<16x32xf32>
    tpu.vector_store %arg6[%c0_3, %c0_4], %2 {strides = array<i32>} : memref<16x32xf32, #tpu.memory_space<vmem>>, vector<16x32xf32>,
    %4 = vector.extract_strided_slice %1 {offsets = [0, 0], sizes = [14, 8], strides = [1, 1]} : vector<16x8xf32> to vector<14x8xf32>
    %c2 = arith.constant 2 : index
    %c0_5 = arith.constant 0 : index
    %5 = vector.load %arg6[%c2, %c0_5] : memref<16x32xf32, #tpu.memory_space<vmem>>, vector<14x8xf32>
    tpu.vector_store %arg6[%c2, %c0_5], %4 {strides = array<i32>} : memref<16x32xf32, #tpu.memory_space<vmem>>, vector<14x8xf32>,
    %6 = vector.extract_strided_slice %1 {offsets = [0, 0], sizes = [15, 8], strides = [1, 1]} : vector<16x8xf32> to vector<15x8xf32>
    %c1 = arith.constant 1 : index
    %c8 = arith.constant 8 : index
    %7 = vector.load %arg6[%c1, %c8] : memref<16x32xf32, #tpu.memory_space<vmem>>, vector<15x8xf32>
    tpu.vector_store %arg6[%c1, %c8], %6 {strides = array<i32>} : memref<16x32xf32, #tpu.memory_space<vmem>>, vector<15x8xf32>,
    %c0_6 = arith.constant 0 : index
    %c16 = arith.constant 16 : index
    %8 = vector.load %arg6[%c0_6, %c16] : memref<16x32xf32, #tpu.memory_space<vmem>>, vector<16x8xf32>
    tpu.vector_store %arg6[%c0_6, %c16], %1 {strides = array<i32>} : memref<16x32xf32, #tpu.memory_space<vmem>>, vector<16x8xf32>,
    %9 = vector.extract_strided_slice %1 {offsets = [1, 0], sizes = [15, 8], strides = [1, 1]} : vector<16x8xf32> to vector<15x8xf32>
    %c0_7 = arith.constant 0 : index
    %c24 = arith.constant 24 : index
    %10 = vector.load %arg6[%c0_7, %c24] : memref<16x32xf32, #tpu.memory_space<vmem>>, vector<15x8xf32>
    tpu.vector_store %arg6[%c0_7, %c24], %9 {strides = array<i32>} : memref<16x32xf32, #tpu.memory_space<vmem>>, vector<15x8xf32>,
    %c0_8 = arith.constant 0 : index
    %c0_9 = arith.constant 0 : index
    %11 = vector.load %arg6[%c0_8, %c0_9] : memref<16x32xf32, #tpu.memory_space<vmem>>, vector<16x32xf32>
    %12 = arith.truncf %11 : vector<16x32xf32> to vector<16x32xbf16>
    %c0_10 = arith.constant 0 : index
    %c0_11 = arith.constant 0 : index
    %c0_12 = arith.constant 0 : index
    %13 = vector.load %arg3[%c0_10, %c0_11, %c0_12] : memref<1x32x8xbf16, #tpu.memory_space<vmem>>, vector<1x32x8xbf16>
    %14 = vector.shape_cast %13 : vector<1x32x8xbf16> to vector<32x8xbf16>
    %cst_13 = arith.constant dense<0.000000e+00> : vector<16x8xf32>
    %15 = tpu.matmul %12, %14, %cst_13 {dimension_numbers = #tpu.dot_dimension_numbers<[1], [0], [0], [1], [0, 0, 1, 1], [], []>} : vector<16x32xbf16>, vector<32x8xbf16>, vector<16x8xf32> -> vector<16x8xf32>
    %c0_14 = arith.constant 0 : index
    %c0_15 = arith.constant 0 : index
    %c0_16 = arith.constant 0 : index
    %16 = vector.load %arg4[%c0_14, %c0_15, %c0_16] : memref<1x1x8xf32, #tpu.memory_space<vmem>>, vector<1x1x8xf32>
    %17 = vector.shape_cast %16 : vector<1x1x8xf32> to vector<8xf32>
    %18 = vector.shape_cast %17 : vector<8xf32> to vector<1x8xf32>
    %19 = vector.broadcast %18 : vector<1x8xf32> to vector<16x8xf32>
    %20 = arith.addf %15, %19 : vector<16x8xf32>
    %cst_17 = arith.constant 5.000000e-01 : f32
    %21 = vector.broadcast %cst_17 : f32 to vector<16x8xf32>
    %22 = arith.mulf %21, %20 : vector<16x8xf32>
    %cst_18 = arith.constant 0.707106769 : f32
    %23 = vector.broadcast %cst_18 : f32 to vector<16x8xf32>
    %24 = arith.mulf %20, %23 : vector<16x8xf32>
    %25 = math.erf %24 : vector<16x8xf32>
    %cst_19 = arith.constant 1.000000e+00 : f32
    %26 = vector.broadcast %cst_19 : f32 to vector<16x8xf32>
    %27 = arith.addf %26, %25 : vector<16x8xf32>
    %28 = arith.mulf %22, %27 : vector<16x8xf32>
    %29 = arith.addf %1, %28 : vector<16x8xf32>
    %c0_20 = arith.constant 0 : index
    %c0_21 = arith.constant 0 : index
    %c0_22 = arith.constant 0 : index
    %c0_23 = arith.constant 0 : index
    %30 = vector.load %arg5[%c0_20, %c0_21, %c0_22, %c0_23] : memref<1x1x16x8xf32, #tpu.memory_space<vmem>>, vector<1x1x16x8xf32>
    %31 = vector.shape_cast %30 : vector<1x1x16x8xf32> to vector<16x8xf32>
    %32 = vector.shape_cast %29 : vector<16x8xf32> to vector<1x1x16x8xf32>
    tpu.vector_store %arg5[%c0_20, %c0_21, %c0_22, %c0_23], %32 {strides = array<i32>} : memref<1x1x16x8xf32, #tpu.memory_space<vmem>>, vector<1x1x16x8xf32>,
    return
  }
  func.func @transform_0(%arg0: i32, %arg1: i32) -> (i32, i32, i32, i32) {
    %c0_i32 = arith.constant 0 : i32
    %c0_i32_0 = arith.constant 0 : i32
    %c0_i32_1 = arith.constant 0 : i32
    return %arg0, %arg1, %c0_i32, %c0_i32_0 : i32, i32, i32, i32
  }
  func.func @transform_1(%arg0: i32, %arg1: i32) -> (i32, i32, i32) {
    %c0_i32 = arith.constant 0 : i32
    %c0_i32_0 = arith.constant 0 : i32
    %c0_i32_1 = arith.constant 0 : i32
    return %arg1, %c0_i32, %c0_i32_0 : i32, i32, i32
  }
  func.func @transform_2(%arg0: i32, %arg1: i32) -> (i32, i32, i32) {
    %c0_i32 = arith.constant 0 : i32
    %c0_i32_0 = arith.constant 0 : i32
    %c0_i32_1 = arith.constant 0 : i32
    return %arg1, %c0_i32, %c0_i32_0 : i32, i32, i32
  }
  func.func @transform_3(%arg0: i32, %arg1: i32) -> (i32, i32, i32, i32) {
    %c0_i32 = arith.constant 0 : i32
    %c0_i32_0 = arith.constant 0 : i32
    %c0_i32_1 = arith.constant 0 : i32
    return %arg0, %arg1, %c0_i32, %c0_i32_0 : i32, i32, i32, i32
  }
}

</mosaic_0001>

<bundles_post_ra>
// kernel: tpu_custom_call.1
= control target key start
LH: loop header
LB: loop body
LE: loop exit
PB: predicated region body
PF: predicated region fallthrough
CT: control target
= control target key end

     0   :  { %s1340_s0 = inlined_call_operand.hbm [shape: f32[2,4,16,8], index: 0, kind: input, shape index: {}]   ;;  %s1341_s1 = inlined_call_operand.hbm [shape: bf16[4,32,8], index: 1, kind: input, shape index: {}]   ;;  %s1342_s2 = inlined_call_operand.hbm [shape: f32[4,1,8], index: 2, kind: input, shape index: {}]   ;;  %s1343_s3 = inlined_call_operand.hbm [shape: f32[2,4,16,8], index: 3, kind: output, shape index: {}]  }
   0x1   :  { %1359 = sst [smem:[#allocation20_spill]] %s1341_s1 }
   0x2   :  { %1360 = sst [smem:[#allocation21_spill]] %s1343_s3 }
   0x3   :  { %8 = vsyncpa [#allocation4], 0 }
   0x4   :  { %10 = vsyncpa [#allocation4 + $0x1], 0 }
   0x5   :  { %11 = vsyncpa [#allocation7], 0 }
   0x6   :  { %13 = vsyncpa [#allocation7 + $0x1], 0 }
   0x7   :  { %14 = vsyncpa [#allocation5], 0 }
   0x8   :  { %16 = vsyncpa [#allocation5 + $0x1], 0  ;;  %s967_s12 = smov 0   ;;  %s969_s13 = smov 0  }
   0x9   :  { %s971_s14 = smov 0   ;;  %s973_s15 = smov 0  }
   0xa   :  { %s975_s16 = smov 0   ;;  %s977_s17 = smov 0  }
   0xb   :  { %s979_s18 = smov 0   ;;  %s981_s19 = smov 0  }
   0xc   :  { %s983_s20 = smov 0   ;;  %s985_s21 = smov 0  }
   0xd   :  { %s987_s22 = smov 0  }
   0xe LB: > { %1361 = sst [smem:[#allocation13_spill]] %s903_s15  ;;  %s1021_s23 = sadd.s32 4294967295, %s931_s22   ;;  %s931_s22 = sphi %s987_s22, %s22_s22   ;;  %s927_s21 = sphi %s985_s21, %s1407_s21   ;;  %s923_s20 = sphi %s983_s20, %s1406_s20   ;;  %s919_s19 = sphi %s981_s19, %s1405_s19   ;;  %s915_s18 = sphi %s979_s18, %s1404_s18   ;;  %s911_s17 = sphi %s977_s17, %s1403_s17   ;;  %s907_s16 = sphi %s975_s16, %s1402_s16   ;;  %s903_s15 = sphi %s973_s15, %s1401_s15   ;;  %s899_s14 = sphi %s971_s14, %s1400_s14   ;;  %s895_s13 = sphi %s969_s13, %s1399_s13   ;;  %s891_s12 = sphi %s967_s12, %s1398_s12  }
   0xf   : > { %1362 = sst [smem:[#allocation14_spill]] %s915_s18  ;;  %s31_s24 = sadd.s32 1, %s923_s20 }
  0x10   : > { %1363 = sst [smem:[#allocation15_spill]] %s919_s19  ;;  %p1024_p0 = scmp.ge.s32.totalorder %s31_s24, 4 }
  0x11   : > { %p1347_p1 = scmp.eq.s32.totalorder %s931_s22, 0  ;;  %p1346_p2 = scmp.eq.s32.totalorder %s1021_s23, 0 }
  0x12   : > { %s69_s26 = sadd.s32 1, %s899_s14  ;;  %s1409_s24 = smov (%p1024_p0, %s31_s24), 0 }
  0x13   : > { %1365 = sst [smem:[#allocation16_spill]] %s1409_s24  ;;  %p76_p3 = scmp.ne.s32.totalorder %s899_s14, %s895_s13 }
  0x14   : > { %p82_p4 = scmp.ne.s32.totalorder %s895_s13, %s891_s12  ;;  %s1040_s27 = ssub.s32 %s923_s20, %s1409_s24 }
  0x15   : > { %p67_p5 = scmp.eq.s32.totalorder %s1040_s27, 0  ;;  %p78_p6 = por %p76_p3, %p1347_p1 }
  0x16   : > { %p1047_p7 = por %p82_p4, %p1346_p2  ;;  %p1345_p8 = scmp.lt.s32.totalorder %s931_s22, 8 }
  0x17   : > { %s1053_s29 = scalar_select %p67_p5, %s899_s14, %s69_s26  }
  0x18   : > { %s1366_s28 = scalar_select %p1047_p7, 1, 0 }
  0x19   : > { %1368 = sst [smem:[#allocation18_spill]] %s1053_s29  ;;  %s183_s30 = sand.u32 1, %s931_s22  }
  0x1a   : > { %1367 = sst [smem:[#allocation17_spill]] %s1366_s28  ;;  %s1344_s4 = sand.u32 1, %s899_s14  }
  0x1b   : > { %s557_s5 = sshll.u32 %s1344_s4, 4  ;;  %s575_s6 = sshll.u32 %s923_s20, 8 }
  0x1c   : > { %s1369_s1 = sld [smem:[#allocation20_spill]]  ;;  %s187_s10 = scalar_lea.vmem [#allocation6], %s557_s5 }
  0x1d   : > { %s194_s11 = sshll.u32 %s187_s10, 4  ;;  %p1069_p9 = pnand %p1345_p8, %p78_p6  ;;  %s1065_s11 = int_to_ptr.vmem [resolvable:$true] %s194_s11 }
  0x1e   : > { %s1074_s26 = scalar_lea.sflag [#allocation7], %s183_s30 }
  0x1f   : > { %p1356_p12 = pneg %p1069_p9 }
  0x22   : > { %s1063_s9 = scalar_lea.hbm %s1369_s1, %s575_s6  ;;  %s720_s8 = scalar_lea.hbm %s1369_s1, 1024 }
  0x23   : > { %s715_s6 = scalar_lea.hbm %s1063_s9, 256  ;;  %p721_p4 = scmp.lt.u32.totalorder %s1063_s9, %s1369_s1 }
  0x24   : > { %p716_p11 = scmp.ne.s32.totalorder %s1063_s9, %s715_s6  ;;  %p722_p5 = scmp.lt.u32.totalorder %s720_s8, %s715_s6 }
  0x25   : > { %p724_p8 = scmp.lt.u32.totalorder %s715_s6, %s1063_s9 }
  0x26   : > { %p718_p13 = pnand %p1356_p12, %p716_p11  ;;  %p723_p6 = por %p722_p5, %p721_p4 }
  0x28   : > { %p719_p3 = pneg %p718_p13  ;;  %p725_p2 = por %p724_p8, %p723_p6 }
  0x2a   : > { %p726_p1 = pnand %p725_p2, %p719_p3 }
  0x2c   : > { %729 = shalt.err (!%p726_p1)
}
  0x2d   : > { %s730_s30 = scalar_lea.vmem %s1065_s11, 256  ;;  %s933_s5 = smov [#allocation6]  }
  0x2e   : > { %p731_p11 = scmp.ne.s32.totalorder %s1065_s11, %s730_s30  ;;  %s735_s7 = sshll.u32 %s933_s5, 4  ;;  %s736_s7 = int_to_ptr.vmem [resolvable:$false] %s735_s7 }
  0x2f   : > { %s737_s4 = scalar_lea.vmem %s736_s7, 512  ;;  %p738_p7 = scmp.lt.s32.totalorder %s1065_s11, %s736_s7 }
  0x30   : > { %p733_p13 = pnand %p731_p11, %p1356_p12  ;;  %p739_p4 = scmp.lt.s32.totalorder %s737_s4, %s730_s30 }
  0x32   : > { %p734_p10 = pneg %p733_p13  ;;  %p740_p5 = por %p739_p4, %p738_p7 }
  0x34   : > { %p741_p8 = pnand %p740_p5, %p734_p10 }
  0x36   : > { %744 = shalt.err (!%p741_p8)
}
  0x37   : > { %s934_s6 = smov 64   ;;  %s935_s8 = smov 4  }
  0x38   : > { %601 = dma.hbm_to_vmem [thread:$0]  (!%p1069_p9), %s1063_s9, 256, %s1065_s11, %s1074_s26, %s934_s6, %s934_s6, %s935_s8  }
  0x39   : > { %p219_p1 = scmp.lt.s32.totalorder %s931_s22, 9  ;;  %p1371_p2 = scmp.ge.s32.totalorder %s931_s22, 1 }
  0x3a   : > { %s550_s30 = sadd.s32 4294967294, %s931_s22   ;;  %s34_s5 = sadd.s32 1, %s927_s21 }
  0x3b   : > { %p1105_p7 = pnand %p1371_p2, %p219_p1  ;;  %s1411_s5 = smov (!%p1024_p0, %s34_s5), %s927_s21 }
  0x3c   : > { %s43_s7 = sadd.s32 1, %s911_s17  ;;  %p50_p10 = scmp.ne.s32.totalorder %s911_s17, %s907_s16 }
  0x3d   : > { %s1372_s10 = scalar_select %p1105_p7, 1, 0 }
  0x3e   : > { %p36_p3 = scmp.ge.s32.totalorder %s1411_s5, 2  ;;  %p56_p6 = scmp.ne.s32.totalorder %s907_s16, %s903_s15 }
  0x3f   : > { %p1373_p11 = scmp.eq.s32.totalorder %s931_s22, 0  ;;  %p134_p4 = scmp.eq.s32.totalorder %s1021_s23, 7 }
  0x40   : > { %s1413_s5 = smov (%p36_p3, %s1411_s5), 0  ;;  %p1375_p5 = scmp.eq.s32.totalorder %s1021_s23, 0 }
  0x41   : > { %p1121_p13 = por %p1373_p11, %p50_p10  ;;  %p1134_p0 = por %p134_p4, %p50_p10 }
  0x42   : > { %p1130_p8 = por %p1375_p5, %p56_p6  ;;  %s38_s4 = ssub.s32 %s927_s21, %s1413_s5 }
  0x43   : > { %s1377_s11 = scalar_select %p1134_p0, 1, 0 }
  0x44   : > { %s1376_s25 = scalar_select %p1130_p8, 1, 0 }
  0x45   : > { %1378 = sst [smem:[#allocation19_spill]] %s1377_s11  ;;  %p140_p1 = scmp.eq.s32.totalorder %s550_s30, 7 }
  0x46   : > { %s40_s6 = sor.u32 %s1040_s27, %s38_s4  ;;  %s160_s8 = sand.u32 1, %s911_s17  }
  0x47   : > { %p41_p2 = scmp.eq.s32.totalorder %s40_s6, 0  ;;  %p1142_p11 = por %p140_p1, %p56_p6 }
  0x48   : > { %s553_s24 = sshll.u32 %s160_s8, 4  ;;  %s554_s15 = sshll.u32 %s923_s20, 1 }
  0x49   : > { %s1379_s1 = scalar_select %p1142_p11, 1, 0 }
  0x4a   : > { %s1147_s29 = scalar_select %p41_p2, %s911_s17, %s43_s7  }
  0x4b   : > { %s555_s3 = sshll.u32 %s927_s21, 3  ;;  %s164_s19 = scalar_lea.vmem [#allocation3], %s553_s24 }
  0x4c   : > { %s173_s18 = sshll.u32 %s164_s19, 4  ;;  %s170_s28 = sadd.s32 %s555_s3, %s554_s15  ;;  %s1151_s18 = int_to_ptr.vmem [resolvable:$true] %s173_s18 }
  0x4d   : > { %s556_s11 = sshll.u32 %s170_s28, 7  ;;  %p1380_p10 = scmp.lt.s32.totalorder %s931_s22, 8 }
  0x4e   : > { %s1164_s7 = scalar_lea.hbm %s1340_s0, %s556_s11  ;;  %s1166_s3 = scalar_lea.sflag [#allocation4], %s160_s8 }
  0x4f   : > { %p1157_p3 = pnand %p1380_p10, %p1121_p13  ;;  %s745_s15 = scalar_lea.hbm %s1164_s7, 256 }
  0x50   : > { %p746_p6 = scmp.ne.s32.totalorder %s1164_s7, %s745_s15  ;;  %s750_s28 = scalar_lea.hbm %s1340_s0, 2048 }
  0x51   : > { %p747_p13 = pneg %p1157_p3  ;;  %p751_p1 = scmp.lt.u32.totalorder %s1164_s7, %s1340_s0 }
  0x52   : > { %p752_p2 = scmp.lt.u32.totalorder %s750_s28, %s745_s15  ;;  %p754_p12 = scmp.lt.u32.totalorder %s745_s15, %s1164_s7 }
  0x53   : > { %p748_p4 = pnand %p747_p13, %p746_p6 }
  0x54   : > { %p753_p10 = por %p752_p2, %p751_p1 }
  0x55   : > { %p749_p5 = pneg %p748_p4 }
  0x56   : > { %p755_p11 = por %p754_p12, %p753_p10 }
  0x58   : > { %p756_p0 = pnand %p755_p11, %p749_p5 }
  0x5a   : > { %759 = shalt.err (!%p756_p0)
}
  0x5b   : > { %s760_s6 = scalar_lea.vmem %s1151_s18, 256  ;;  %s936_s8 = smov [#allocation3]  }
  0x5c   : > { %p761_p6 = scmp.ne.s32.totalorder %s1151_s18, %s760_s6  ;;  %s765_s30 = sshll.u32 %s936_s8, 4  ;;  %s766_s30 = int_to_ptr.vmem [resolvable:$false] %s765_s30 }
  0x5d   : > { %s767_s4 = scalar_lea.vmem %s766_s30, 512  ;;  %p768_p7 = scmp.lt.s32.totalorder %s1151_s18, %s766_s30 }
  0x5e   : > { %p763_p4 = pnand %p761_p6, %p747_p13  ;;  %p769_p1 = scmp.lt.s32.totalorder %s767_s4, %s760_s6 }
  0x60   : > { %p764_p8 = pneg %p763_p4  ;;  %p770_p2 = por %p769_p1, %p768_p7 }
  0x62   : > { %p771_p12 = pnand %p770_p2, %p764_p8 }
  0x64   : > { %774 = shalt.err (!%p771_p12)
}
  0x65   : > { %s937_s15 = smov 128   ;;  %s938_s19 = smov 8  }
  0x66   : > { %598 = dma.hbm_to_vmem [thread:$0]  (!%p1157_p3), %s1164_s7, 256, %s1151_s18, %s1166_s3, %s937_s15, %s937_s15, %s938_s19  }
  0x67   : > { %s560_s24 = sshll.u32 %s923_s20, 4  ;;  %s1382_s6 = sand.u32 1, %s899_s14  }
  0x68   : > { %s1198_s11 = scalar_lea.hbm %s1342_s2, %s560_s24  ;;  %s207_s8 = scalar_lea.vmem [#allocation8], %s1382_s6 }
  0x69   : > { %s214_s30 = sshll.u32 %s207_s8, 4  ;;  %s775_s4 = scalar_lea.hbm %s1198_s11, 16  ;;  %s215_s30 = int_to_ptr.vmem [resolvable:$true] %s214_s30 }
  0x6a   : > { %p776_p7 = scmp.ne.s32.totalorder %s1198_s11, %s775_s4  ;;  %p1383_p8 = pneg %p1069_p9 }
  0x6b   : > { %s780_s7 = scalar_lea.hbm %s1342_s2, 64  ;;  %p781_p3 = scmp.lt.u32.totalorder %s1198_s11, %s1342_s2 }
  0x6c   : > { %p778_p0 = pnand %p776_p7, %p1383_p8  ;;  %p782_p13 = scmp.lt.u32.totalorder %s780_s7, %s775_s4 }
  0x6d   : > { %p784_p10 = scmp.lt.u32.totalorder %s775_s4, %s1198_s11 }
  0x6e   : > { %p779_p11 = pneg %p778_p0  ;;  %p783_p5 = por %p782_p13, %p781_p3 }
  0x70   : > { %p785_p6 = por %p784_p10, %p783_p5 }
  0x72   : > { %p786_p4 = pnand %p785_p6, %p779_p11 }
  0x74   : > { %789 = shalt.err (!%p786_p4)
}
  0x75   : > { %s790_s19 = scalar_lea.vmem %s215_s30, 16  ;;  %p1384_p2 = pmov %p1383_p8 }
  0x76   : > { %p791_p1 = scmp.ne.s32.totalorder %s215_s30, %s790_s19  ;;  %s939_s24 = smov [#allocation8]  }
  0x77   : > { %s795_s28 = sshll.u32 %s939_s24, 4  ;;  %s796_s28 = int_to_ptr.vmem [resolvable:$false] %s795_s28 }
  0x78   : > { %p793_p12 = pnand %p791_p1, %p1384_p2  ;;  %s797_s9 = scalar_lea.vmem %s796_s28, 32 }
  0x79   : > { %p798_p8 = scmp.lt.s32.totalorder %s215_s30, %s796_s28  ;;  %p799_p0 = scmp.lt.s32.totalorder %s797_s9, %s790_s19 }
  0x7a   : > { %p794_p7 = pneg %p793_p12 }
  0x7b   : > { %p800_p3 = por %p799_p0, %p798_p8 }
  0x7d   : > { %p801_p13 = pnand %p800_p3, %p794_p7 }
  0x7f   : > { %804 = shalt.err (!%p801_p13)
}
  0x80   : > { %604 = dma.hbm_to_vmem [thread:$0]  (!%p1069_p9), %s1198_s11, 16, %s215_s30, %s1074_s26  }
  0x81   : > { %p1385_p11 = scmp.ne.s32.totalorder %s1372_s10, 0 }
  0x82   : > { %s1225_s6 = sand.u32 (!%p1385_p11), 1, %s907_s16   ;;  %p1386_p5 = scmp.ne.s32.totalorder (!%p1385_p11), %s1376_s25, 0 }
  0x83   : > { %223 = sbr.rel (%p1385_p11) target bundleno = 534 (0x216), region = 32  ;;  %s562_s8 = sshll.u32 (!%p1385_p11), %s1225_s6, 4 }
  0x84   : > { %s226_s4 = scalar_lea.sflag (!%p1385_p11), [#allocation4], %s1225_s6  ;;  %s229_s18 = scalar_lea.vmem (!%p1385_p11), [#allocation3], %s562_s8 }
  0x8a   : > { %878 = dma.done.wait (%p1386_p5), %s226_s4, 256  }
  0x8b   : > { %880 = vsyncadd (%p1386_p5), %s226_s4, 4294967040  ;;  %s1387_s12 = sld [smem:[#allocation17_spill]]  ;;  %s234_s26 = sand.u32 1, %s1021_s23  }
  0x8c   : > { %s236_s10 = sand.u32 1, %s895_s13   ;;  %s235_s30 = scalar_lea.sflag [#allocation7], %s234_s26 }
  0x8d   : > { %s563_s11 = sshll.u32 %s236_s10, 4 }
  0x8e   : > { %s238_s27 = scalar_lea.vmem [#allocation6], %s563_s11 }
  0x91   : > { %p1388_p9 = scmp.ne.s32.totalorder %s1387_s12, 0 }
  0x93   : > { %882 = dma.done.wait (%p1388_p9), %s235_s30, 272  }
  0x94   : > { %884 = vsyncadd (%p1388_p9), %s235_s30, 4294967024  ;;  %vm281_vm0 = vcmask 261120   ;;  %v940_v0 = vmov 0.0   ;;  %vm941_vm1 = vmmov 0   ;;  %vm284_vm2 = vcmask 64512   ;;  %v1245_v1 = vld [vmem:[%s229_s18] sm:$0xff] }
  0x95   : > { %282 = vst.msk [vmem:[#allocation2] sm:$0xff] %vm281_vm0, %v940_v0  ;;  %283 = vst.msk [vmem:[#allocation2 + $0x8] sm:$0xff] %vm281_vm0, %v940_v0  ;;  %579 = vmatprep.subr.bf16.mxu0 %v940_v0  ;;  %583 = vmatprep.mubr.msk.bf16.mxu0 %vm941_vm1, %v940_v0  ;;  %vm286_vm3 = vcmask 62464   ;;  %v1247_v2 = vld [vmem:[%s229_s18 + $0x8] sm:$0xff]  ;;  %s942_s23 = smov 16   ;;  %s943_s25 = smov 8  }
  0x96   : > { %300 = vrot.lane.b32.xlu1 %v1245_v1, %s942_s23  ;;  %290 = vrot.lane.b32.xlu0 %v1245_v1, %s943_s25  ;;  %287 = vst.msk [vmem:[#allocation2 + $0xa] sm:$0x3f] %vm286_vm3, %v1247_v2  ;;  %v709_v3 = vld [vmem:[%s238_s27] sm:$0xff]   ;;  %v710_v4 = vld [vmem:[%s238_s27 + $0x8] sm:$0xff]   ;;  %s944_s7 = smov 24   ;;  %vm296_vm4 = vcmask 130112  }
  0x97   : > { %285 = vst.msk [vmem:[#allocation2 + $0x2] sm:$0xff] %vm284_vm2, %v1245_v1  ;;  %580 = vmatpush3.bf16.msra.mxu0 %v709_v3  ;;  %vm306_vm5 = vcmask 195712   ;;  %vm298_vm6 = vcmask 129088   ;;  %vm315_vm7 = vcmask 261313   ;;  %vm317_vm8 = vcmask 261312   ;;  %s1389_s3 = sld [smem:[#allocation14_spill]] }
  0x98   : > { %581 = vmatprep.subr.bf16.mxu0 %v940_v0  ;;  %s1390_s15 = sld [smem:[#allocation15_spill]]  ;;  %s246_s19 = scalar_lea.vmem [#allocation8], %s236_s10 }
  0x99   : > { %v565_v14 = vld [vmem:[%s246_s19] ss:$0 sm:$0xff]  ;;  %s1391_s4 = sld [smem:[#allocation19_spill]]  ;;  %s277_s12 = scalar_lea.vmem [#allocation9], %s562_s8 }
  0x9a   : > { %302 = vrot.lane.b32.xlu1 %v1247_v2, %s942_s23  ;;  %292 = vrot.lane.b32.xlu0 %v1247_v2, %s943_s25  ;;  %s419_s26 = sshll.u32 %s277_s12, 4  ;;  %s1392_s30 = sld [smem:[#allocation21_spill]]  ;;  %s1275_s26 = int_to_ptr.vmem [resolvable:$true] %s419_s26 }
  0x9b   : > { %582 = vmatpush3.bf16.msra.mxu0 %v710_v4  ;;  %s404_s8 = scalar_lea.sflag [#allocation5], %s1225_s6  ;;  %s805_s23 = scalar_lea.vmem %s1275_s26, 256 }
  0x9c   : > { %p806_p10 = scmp.ne.s32.totalorder %s1275_s26, %s805_s23 }
  0x9d   : > { %s570_s24 = sshll.u32 %s1389_s3, 1 }
  0x9e   : > { %311 = vrot.lane.b32.xlu1 %v1247_v2, %s944_s7  ;;  %309 = vrot.lane.b32.xlu0 %v1245_v1, %s944_s7  ;;  %s571_s28 = sshll.u32 %s1390_s15, 3  ;;  %s945_s7 = smov [#allocation9]  }
  0x9f   : > { %s416_s9 = sadd.s32 %s571_s28, %s570_s24  ;;  %p1393_p6 = scmp.ne.s32.totalorder %s1391_s4, 0 }
  0xa0   : > { %s572_s18 = sshll.u32 %s416_s9, 7  ;;  %s809_s3 = sshll.u32 %s945_s7, 4  ;;  %s810_s3 = int_to_ptr.vmem [resolvable:$false] %s809_s3 }
  0xa1   : > { %s1271_s27 = scalar_lea.hbm %s1392_s30, %s572_s18  ;;  %p807_p4 = pnand %p806_p10, %p1393_p6 }
  0xa2   : > { %s811_s15 = scalar_lea.vmem %s810_s3, 512  ;;  %p812_p2 = scmp.lt.s32.totalorder %s1275_s26, %s810_s3 }
  0xa3   : > { %p808_p1 = pneg %p807_p4  ;;  %p813_p12 = scmp.lt.s32.totalorder %s811_s15, %s805_s23 }
  0xa5   : > { %p814_p7 = por %p813_p12, %p812_p2 }
  0xa7   : > { %p815_p8 = pnand %p814_p7, %p808_p1 }
 0x108   : > { %v301_v5 = vpop.permute.xlu1 %300  ;;  %v291_v6 = vpop.permute.xlu0 %290 }
 0x109   : > { %297 = vst.msk [vmem:[#allocation2 + $0x1] sm:$0xff] %vm296_vm4, %v291_v6 }
 0x10a   : > { %307 = vst.msk [vmem:[#allocation2] sm:$0xff] %vm306_vm5, %v301_v5 }
 0x10c   : > { %v303_v7 = vpop.permute.xlu1 %302  ;;  %v293_v8 = vpop.permute.xlu0 %292 }
 0x10d   : > { %299 = vst.msk [vmem:[#allocation2 + $0x9] sm:$0x7f] %vm298_vm6, %v293_v8 }
 0x10e   : > { %308 = vst.msk [vmem:[#allocation2 + $0x8] sm:$0xff] %vm306_vm5, %v303_v7 }
 0x110   : > { %v312_v9 = vpop.permute.xlu1 %311  ;;  %v310_v10 = vpop.permute.xlu0 %309 }
 0x111   : > { %316 = vst.msk [vmem:[#allocation2 - $0x1] sm:$0xfe] %vm315_vm7, %v310_v10 }
 0x112   : > { %318 = vst.msk [vmem:[#allocation2 + $0x7] sm:$0xff] %vm317_vm8, %v312_v9 }
 0x119   : > { %v319_v11 = vld [vmem:[#allocation2] sm:$0xff]  ;;  %v320_v12 = vld [vmem:[#allocation2 + $0x8] sm:$0xff] }
 0x11a   : > { %v321_v13 = vpack.c.bf16 %v320_v12, %v319_v11 }
 0x11c   : > { %584 = vmatmul.mubr.msk.bf16.vlgmr.msra.gmra.mrb[0].mxu0 %vm281_vm0, %v321_v13 }
 0x1ef   : > { %v382_v15 = vpop.f32.mrb[0].mxu0 }
 0x1f0   : > { %v383_v16 = vadd.f32 %v565_v14, %v382_v15  ;;  %v585_v17 = vpop.f32.mrb[1].mxu0 }
 0x1f1   : > { %v385_v18 = vpop.f32.mrb[2].mxu0 }
 0x1f2   : > { %v391_v19 = vmul.f32 0.70710677, %v383_v16  ;;  %v386_v20 = vadd.f32 %v565_v14, %v385_v18  ;;  %v586_v21 = vpop.f32.mrb[3].mxu0  ;;  %v389_v24 = vmul.f32 0.5, %v383_v16 }
 0x1f4   : > { %711 = verf.f32 %v391_v19  ;;  %v392_v22 = vmul.f32 0.70710677, %v386_v20  ;;  %v390_v28 = vmul.f32 0.5, %v386_v20 }
 0x1f6   : > { %713 = verf.f32 %v392_v22 }
 0x1fe   : > { %v712_v23 = vpop.eup %711 }
 0x1ff   : > { %v395_v25 = vadd.f32 1.0, %v712_v23 }
 0x200   : > { %v714_v26 = vpop.eup %713 }
 0x201   : > { %v397_v27 = vmul.f32 %v395_v25, %v389_v24  ;;  %v396_v29 = vadd.f32 1.0, %v714_v26 }
 0x203   : > { %v399_v30 = vadd.f32 %v397_v27, %v1245_v1  ;;  %v398_v31 = vmul.f32 %v396_v29, %v390_v28 }
 0x205   : > { %401 = vst.msk [vmem:[%s277_s12] sm:$0xff] %vm284_vm2, %v399_v30  ;;  %v400_v32 = vadd.f32 %v398_v31, %v1247_v2 }
 0x207   : > { %402 = vst.msk [vmem:[%s277_s12 + $0x8] sm:$0xff] %vm284_vm2, %v400_v32 }
 0x208   : > { %818 = shalt.err (!%p815_p8)
}
 0x209   : > { %s819_s19 = scalar_lea.hbm %s1271_s27, 256  ;;  %s823_s9 = scalar_lea.hbm %s1392_s30, 2048 }
 0x20a   : > { %p820_p0 = scmp.ne.s32.totalorder %s1271_s27, %s819_s19  ;;  %p824_p11 = scmp.lt.u32.totalorder %s1271_s27, %s1392_s30 }
 0x20b   : > { %p825_p5 = scmp.lt.u32.totalorder %s823_s9, %s819_s19  ;;  %p827_p10 = scmp.lt.u32.totalorder %s819_s19, %s1271_s27 }
 0x20c   : > { %p821_p3 = pnand %p820_p0, %p1393_p6 }
 0x20d   : > { %p826_p9 = por %p825_p5, %p824_p11 }
 0x20e   : > { %p822_p13 = pneg %p821_p3 }
 0x20f   : > { %p828_p4 = por %p827_p10, %p826_p9 }
 0x211   : > { %p829_p1 = pnand %p828_p4, %p822_p13 }
 0x213   : > { %832 = shalt.err (!%p829_p1)
}
 0x214   : > { %s946_s10 = smov 128  }
 0x215   : > { %593 = dma.vmem_to_hbm [thread:$0]  (%p1393_p6), %s1275_s26, 256, %s1271_s27, %s404_s8, %s946_s10, %s946_s10, %s943_s25  }
 0x216 PF: > { %s1394_s11 = sld [smem:[#allocation13_spill]]  ;;  %p610_p2 = scmp.ge.s32.totalorder %s931_s22, 2 }
 0x217   : > { %p1395_p12 = scmp.ne.s32.totalorder %s1379_s1, 0 }
 0x219   : > { %p606_p7 = pnand %p610_p2, %p1395_p12 }
 0x21c   : > { %s434_s23 = sand.u32 1, %s1394_s11  }
 0x21d   : > { %s435_s7 = scalar_lea.sflag [#allocation5], %s434_s23 }
 0x21e   : > { %886 = dma.done.wait (!%p606_p7), %s435_s7, 256  }
 0x21f   : > { %888 = vsyncadd (!%p606_p7), %s435_s7, 4294967040  ;;  %s22_s22 = sadd.s32 1, %s931_s22   ;;  %s1396_s6 = sld [smem:[#allocation18_spill]] }
 0x220   : > { %p19_p8 = scmp.ge.s32.totalorder %s22_s22, 10   ;;  %s1397_s25 = sld [smem:[#allocation16_spill]] }
 0x221   : > { %s1398_s12 = smov %s895_s13  ;;  %s1399_s13 = smov %s899_s14 }
 0x222   : > { %s1401_s15 = smov %s907_s16  ;;  %s1402_s16 = smov %s911_s17 }
 0x223   : > { %s1403_s17 = smov %s1147_s29  ;;  %s1404_s18 = smov %s923_s20 }
 0x224   : > { %s1405_s19 = smov %s927_s21  ;;  %s1407_s21 = smov %s1413_s5 }
 0x225   : > { %s1400_s14 = smov %s1396_s6  ;;  %21 = sbr.rel (!%p19_p8) target bundleno = 14 (0xe), region = 101 }
 0x226   : > { %s1406_s20 = smov %s1397_s25 }
 0x22c   :  { %440 = vsyncpa [#allocation4], 1 }
 0x22d   :  { %442 = vsyncpa [#allocation4 + $0x1], 1 }
 0x22e   :  { %443 = vsyncpa [#allocation7], 1 }
 0x22f   :  { %445 = vsyncpa [#allocation7 + $0x1], 1 }
 0x230   :  { %446 = vsyncpa [#allocation5], 1 }
 0x231   :  { %448 = vsyncpa [#allocation5 + $0x1], 1 }

</bundles_post_ra>
